<compile_context>
chip_gen: v5e
topology: v5e:2x2
jax: 0.10.0
libtpu: 0.0.40
codegen_flags: <defaults>
</compile_context>

<pallas_src>
import functools

import jax
import jax.numpy as jnp
from jax.experimental import pallas as pl
from jax.experimental.pallas import tpu as pltpu


# -----------------------------------------------------------------------------
# Pallas kernel: whole-batch cross-level multi-head attention (single call).
# -----------------------------------------------------------------------------
def _cross_level_attn_kernel(
    x_ref,      # (B, 2S, E)  [low ; high] pre-stacked along the sequence axis
    lev_ref,    # (B, 1, E)   level embedding (already tiled x4)
    wqkv_ref,   # (E, 3E)     fused Q|K|V weights; 1/sqrt(d) folded into Q part
    wo_ref,     # (E, E)      output projection (stored transposed: x @ W)
    bqkv_ref,   # (1, 3E)     fused Q|K|V bias; 1/sqrt(d) folded into Q part
    bo_ref,     # (1, E)      output bias
    *out_refs,
    num_heads: int,
    compute_weights: bool,
):
    if compute_weights:
        out_ref, attn_ref = out_refs
    else:
        (out_ref,) = out_refs
        attn_ref = None

    B, two_s, E = x_ref.shape
    S = two_s // 2
    H = num_heads
    d = E // H

    # Level enhancement fused into the kernel (broadcast over the whole slab).
    # Leading-dim merge (B,2S,E)->(B*2S,E) is sublane-tile aligned (S mult of 8
    # here would be ideal; at S=8 it is) -> effectively free relayout.
    x = (x_ref[...] + lev_ref[...]).reshape(B * two_s, E)          # (B*2S, E)

    # ONE fused QKV projection for every batch element and both sources.
    qkv = (
        jnp.dot(x, wqkv_ref[...], preferred_element_type=jnp.float32)
        + bqkv_ref[...]
    )                                                              # (B*2S, 3E)

    # ---- scores for every (batch, head), stacked along sublanes -------------
    score_blocks = []
    for b in range(B):
        q_b = qkv[b * two_s: b * two_s + S, 0:E]          # (S, E), pre-scaled
        k_b = qkv[b * two_s + S: (b + 1) * two_s, E:2 * E]          # (S, E)
        for h in range(H):
            lo = h * d
            score_blocks.append(
                jax.lax.dot_general(
                    q_b[:, lo:lo + d], k_b[:, lo:lo + d],
                    dimension_numbers=(((1,), (1,)), ((), ())),
                    preferred_element_type=jnp.float32,
                )                                                   # (S, S)
            )
    scores = jnp.concatenate(score_blocks, axis=0)                  # (B*H*S, S)

    # ---- ONE softmax over the stacked scores ---------------------------------
    scores = scores - jnp.max(scores, axis=-1, keepdims=True)
    e = jnp.exp(scores)
    denom = jnp.sum(e, axis=-1, keepdims=True)
    if compute_weights:
        # Exact divide: returned attention rows must sum to 1.
        p = e / denom
    else:
        # Divide on the (otherwise idle) EUP slot.
        p = e * pl.reciprocal(denom, approx=True)

    # ---- per-head contexts, assembled once, fed straight into Wo ------------
    ctx_blocks = []
    for b in range(B):
        v_b = qkv[b * two_s + S: (b + 1) * two_s, 2 * E:3 * E]      # (S, E)
        head_ctx = []
        for h in range(H):
            p_bh = p[(b * H + h) * S: (b * H + h + 1) * S, :]       # (S, S)
            head_ctx.append(
                jnp.dot(p_bh, v_b[:, h * d:(h + 1) * d],
                        preferred_element_type=jnp.float32)         # (S, d)
            )
        ctx_blocks.append(jnp.concatenate(head_ctx, axis=1))        # (S, E)
    ctx = jnp.concatenate(ctx_blocks, axis=0)                       # (B*S, E)

    out = (
        jnp.dot(ctx, wo_ref[...], preferred_element_type=jnp.float32)
        + bo_ref[...]
    )                                                               # (B*S, E)
    out_ref[...] = out.reshape(B, S, E).astype(out_ref.dtype)

    if compute_weights:
        attn = jnp.mean(p.reshape(B, H, S, S), axis=1)              # (B, S, S)
        attn_ref[...] = attn.astype(attn_ref.dtype)


# -----------------------------------------------------------------------------
# One-time parameter preparation (weight fusion + scale folding, hoisted out
# of the per-call wrapper).
# -----------------------------------------------------------------------------
def prepare_cross_level_attention_params(params, *, num_heads):
    E = params["wq"].shape[0]
    assert E % num_heads == 0, "embed_dim must be divisible by num_heads"
    scale = 1.0 / ((E // num_heads) ** 0.5)
    return {
        "level_embedding": params["level_embedding"],
        "w_qkv": jnp.concatenate(
            [params["wq"] * scale, params["wk"], params["wv"]], axis=1),
        "b_qkv": jnp.concatenate(
            [params["bq"] * scale, params["bk"], params["bv"]], axis=1),
        "wo": params["wo"],
        "bo": params["bo"],
    }


# -----------------------------------------------------------------------------
# Wrapper: glue + pallas_call (no grid -- single invocation for the batch).
# -----------------------------------------------------------------------------
def cross_level_attention(low_level, high_level, hierarchy_level, prepared, *,
                          num_heads, return_weights=True):
    """low_level, high_level: (B, S, E) float32; hierarchy_level: (B,) int32."""
    B, S, E = low_level.shape
    assert high_level.shape == (B, S, E)
    assert E % num_heads == 0, "embed_dim must be divisible by num_heads"
    assert prepared["level_embedding"].shape[1] * 4 == E, (
        "level embedding dim * 4 must equal embed_dim"
    )

    # Cheap glue kept in plain JAX: embedding gather + repeat(1,1,4), and the
    # one-time [low ; high] stacking so the kernel never materialises an
    # in-kernel concat and takes one fewer DMA stream.
    lev = prepared["level_embedding"][hierarchy_level]        # (B, E//4)
    lev_full = jnp.tile(lev, (1, 4))[:, None, :]              # (B, 1, E)
    x_stacked = jnp.concatenate([low_level, high_level], axis=1)  # (B, 2S, E)

    kernel = functools.partial(
        _cross_level_attn_kernel,
        num_heads=num_heads,
        compute_weights=return_weights,
    )

    vmem = pl.BlockSpec(memory_space=pltpu.MemorySpace.VMEM)

    if return_weights:
        out_shape = (
            jax.ShapeDtypeStruct((B, S, E), jnp.float32),
            jax.ShapeDtypeStruct((B, S, S), jnp.float32),
        )
        out_specs = (vmem, vmem)
    else:
        out_shape = jax.ShapeDtypeStruct((B, S, E), jnp.float32)
        out_specs = vmem

    result = pl.pallas_call(
        kernel,
        out_shape=out_shape,
        in_specs=[vmem] * 6,
        out_specs=out_specs,
    )(
        x_stacked, lev_full,
        prepared["w_qkv"], prepared["wo"], prepared["b_qkv"], prepared["bo"],
    )

    if return_weights:
        out, attn = result
        return out, attn
    return result, None


# -----------------------------------------------------------------------------
# Pure-JAX reference (same math) for a sanity check.
# -----------------------------------------------------------------------------
def _reference(low_level, high_level, hierarchy_level, params, *, num_heads):
    B, S, E = low_level.shape
    d = E // num_heads
    lev = jnp.tile(params["level_embedding"][hierarchy_level], (1, 4))[:, None, :]
    q_in = low_level + lev
    kv_in = high_level + lev
    q = q_in @ params["wq"] + params["bq"]
    k = kv_in @ params["wk"] + params["bk"]
    v = kv_in @ params["wv"] + params["bv"]
    qh = q.reshape(B, S, num_heads, d).transpose(0, 2, 1, 3) / (d ** 0.5)
    kh = k.reshape(B, S, num_heads, d).transpose(0, 2, 1, 3)
    vh = v.reshape(B, S, num_heads, d).transpose(0, 2, 1, 3)
    scores = jnp.einsum("bhqd,bhkd->bhqk", qh, kh)
    p = jax.nn.softmax(scores, axis=-1)
    ctx = jnp.einsum("bhqk,bhkd->bhqd", p, vh).transpose(0, 2, 1, 3).reshape(B, S, E)
    out = ctx @ params["wo"] + params["bo"]
    return out, p.mean(axis=1)


# -----------------------------------------------------------------------------
# Main
# -----------------------------------------------------------------------------
if __name__ == "__main__":
    B, S, E, H = 2, 8, 32, 4

    key = jax.random.PRNGKey(0)
    keys = jax.random.split(key, 12)

    # Deterministic synthetic parameters (shapes from the module __init__).
    params = {
        # nn.Embedding(3, embed_dim // 4)
        "level_embedding": jax.random.normal(keys[0], (3, E // 4), jnp.float32) * 0.1,
        # MHA projection weights, stored transposed so x @ W applies them.
        "wq": jax.random.normal(keys[1], (E, E), jnp.float32) * (1.0 / E ** 0.5),
        "wk": jax.random.normal(keys[2], (E, E), jnp.float32) * (1.0 / E ** 0.5),
        "wv": jax.random.normal(keys[3], (E, E), jnp.float32) * (1.0 / E ** 0.5),
        "wo": jax.random.normal(keys[4], (E, E), jnp.float32) * (1.0 / E ** 0.5),
        "bq": jax.random.normal(keys[5], (1, E), jnp.float32) * 0.01,
        "bk": jax.random.normal(keys[6], (1, E), jnp.float32) * 0.01,
        "bv": jax.random.normal(keys[7], (1, E), jnp.float32) * 0.01,
        "bo": jax.random.normal(keys[8], (1, E), jnp.float32) * 0.01,
    }

    low_level = jax.random.normal(keys[9], (B, S, E), jnp.float32)
    high_level = jax.random.normal(keys[10], (B, S, E), jnp.float32)
    hierarchy_level = jnp.array([0, 2], dtype=jnp.int32)

    prepared = prepare_cross_level_attention_params(params, num_heads=H)

    out, attn = cross_level_attention(
        low_level, high_level, hierarchy_level, prepared,
        num_heads=H, return_weights=True,
    )
    out_nw, _ = cross_level_attention(
        low_level, high_level, hierarchy_level, prepared,
        num_heads=H, return_weights=False,
    )
    jax.block_until_ready((out, attn, out_nw))

    ref_out, ref_attn = _reference(
        low_level, high_level, hierarchy_level, params, num_heads=H
    )
    assert out.shape == (B, S, E) and attn.shape == (B, S, S)

    # Exact-softmax path: returned attention rows must sum to 1.
    assert jnp.allclose(attn.sum(axis=-1), 1.0, atol=1e-5)

    TOL_EXACT = 2e-3      # f32 MXU matmul rounding differences vs XLA reference
    TOL_APPROX = 5e-3     # additionally covers the EUP approximate reciprocal
    assert jnp.allclose(out, ref_out, atol=TOL_EXACT, rtol=TOL_EXACT)
    assert jnp.allclose(attn, ref_attn, atol=TOL_EXACT, rtol=TOL_EXACT)
    assert jnp.allclose(out_nw, ref_out, atol=TOL_APPROX, rtol=TOL_APPROX)

    print("KERNEL_OK")
</pallas_src>

<mosaic_0001>
module attributes {stable_mosaic.version = 11 : i64} {
  func.func @_cross_level_attn_kernel(%arg0: memref<2x16x32xf32, #tpu.memory_space<vmem>>, %arg1: memref<2x1x32xf32, #tpu.memory_space<vmem>>, %arg2: memref<32x96xf32, #tpu.memory_space<vmem>>, %arg3: memref<32x32xf32, #tpu.memory_space<vmem>>, %arg4: memref<1x96xf32, #tpu.memory_space<vmem>>, %arg5: memref<1x32xf32, #tpu.memory_space<vmem>>, %arg6: memref<2x8x32xf32, #tpu.memory_space<vmem>>, %arg7: memref<2x8x8xf32, #tpu.memory_space<vmem>>) attributes {dimension_semantics = [], scalar_prefetch = 0 : i64, scratch_operands = 0 : i64, tpu.core_type = #tpu.core_type<tc>} {
    %c0 = arith.constant 0 : index
    %c0_0 = arith.constant 0 : index
    %c0_1 = arith.constant 0 : index
    %0 = vector.load %arg0[%c0, %c0_0, %c0_1] : memref<2x16x32xf32, #tpu.memory_space<vmem>>, vector<2x16x32xf32>
    %c0_2 = arith.constant 0 : index
    %c0_3 = arith.constant 0 : index
    %c0_4 = arith.constant 0 : index
    %1 = vector.load %arg1[%c0_2, %c0_3, %c0_4] : memref<2x1x32xf32, #tpu.memory_space<vmem>>, vector<2x1x32xf32>
    %2 = vector.broadcast %1 : vector<2x1x32xf32> to vector<2x16x32xf32>
    %3 = arith.addf %0, %2 : vector<2x16x32xf32>
    %4 = vector.shape_cast %3 : vector<2x16x32xf32> to vector<32x32xf32>
    %c0_5 = arith.constant 0 : index
    %c0_6 = arith.constant 0 : index
    %5 = vector.load %arg2[%c0_5, %c0_6] : memref<32x96xf32, #tpu.memory_space<vmem>>, vector<32x96xf32>
    %cst = arith.constant dense<0.000000e+00> : vector<32x96xf32>
    %6 = tpu.matmul %4, %5, %cst {dimension_numbers = #tpu.dot_dimension_numbers<[1], [0], [0], [1], [0, 0, 1, 1], [], []>} : vector<32x32xf32>, vector<32x96xf32>, vector<32x96xf32> -> vector<32x96xf32>
    %c0_7 = arith.constant 0 : index
    %c0_8 = arith.constant 0 : index
    %7 = vector.load %arg4[%c0_7, %c0_8] : memref<1x96xf32, #tpu.memory_space<vmem>>, vector<1x96xf32>
    %8 = vector.broadcast %7 : vector<1x96xf32> to vector<32x96xf32>
    %9 = arith.addf %6, %8 : vector<32x96xf32>
    %10 = vector.extract_strided_slice %9 {offsets = [0, 0], sizes = [8, 32], strides = [1, 1]} : vector<32x96xf32> to vector<8x32xf32>
    %11 = vector.extract_strided_slice %9 {offsets = [8, 32], sizes = [8, 32], strides = [1, 1]} : vector<32x96xf32> to vector<8x32xf32>
    %12 = vector.extract_strided_slice %10 {offsets = [0, 0], sizes = [8, 8], strides = [1, 1]} : vector<8x32xf32> to vector<8x8xf32>
    %13 = vector.extract_strided_slice %11 {offsets = [0, 0], sizes = [8, 8], strides = [1, 1]} : vector<8x32xf32> to vector<8x8xf32>
    %cst_9 = arith.constant dense<0.000000e+00> : vector<8x8xf32>
    %14 = tpu.matmul %12, %13, %cst_9 {dimension_numbers = #tpu.dot_dimension_numbers<[1], [1], [0], [0], [0, 0, 1, 0], [], []>} : vector<8x8xf32>, vector<8x8xf32>, vector<8x8xf32> -> vector<8x8xf32>
    %15 = vector.extract_strided_slice %10 {offsets = [0, 8], sizes = [8, 8], strides = [1, 1]} : vector<8x32xf32> to vector<8x8xf32>
    %16 = vector.extract_strided_slice %11 {offsets = [0, 8], sizes = [8, 8], strides = [1, 1]} : vector<8x32xf32> to vector<8x8xf32>
    %cst_10 = arith.constant dense<0.000000e+00> : vector<8x8xf32>
    %17 = tpu.matmul %15, %16, %cst_10 {dimension_numbers = #tpu.dot_dimension_numbers<[1], [1], [0], [0], [0, 0, 1, 0], [], []>} : vector<8x8xf32>, vector<8x8xf32>, vector<8x8xf32> -> vector<8x8xf32>
    %18 = vector.extract_strided_slice %10 {offsets = [0, 16], sizes = [8, 8], strides = [1, 1]} : vector<8x32xf32> to vector<8x8xf32>
    %19 = vector.extract_strided_slice %11 {offsets = [0, 16], sizes = [8, 8], strides = [1, 1]} : vector<8x32xf32> to vector<8x8xf32>
    %cst_11 = arith.constant dense<0.000000e+00> : vector<8x8xf32>
    %20 = tpu.matmul %18, %19, %cst_11 {dimension_numbers = #tpu.dot_dimension_numbers<[1], [1], [0], [0], [0, 0, 1, 0], [], []>} : vector<8x8xf32>, vector<8x8xf32>, vector<8x8xf32> -> vector<8x8xf32>
    %21 = vector.extract_strided_slice %10 {offsets = [0, 24], sizes = [8, 8], strides = [1, 1]} : vector<8x32xf32> to vector<8x8xf32>
    %22 = vector.extract_strided_slice %11 {offsets = [0, 24], sizes = [8, 8], strides = [1, 1]} : vector<8x32xf32> to vector<8x8xf32>
    %cst_12 = arith.constant dense<0.000000e+00> : vector<8x8xf32>
    %23 = tpu.matmul %21, %22, %cst_12 {dimension_numbers = #tpu.dot_dimension_numbers<[1], [1], [0], [0], [0, 0, 1, 0], [], []>} : vector<8x8xf32>, vector<8x8xf32>, vector<8x8xf32> -> vector<8x8xf32>
    %24 = vector.extract_strided_slice %9 {offsets = [16, 0], sizes = [8, 32], strides = [1, 1]} : vector<32x96xf32> to vector<8x32xf32>
    %25 = vector.extract_strided_slice %9 {offsets = [24, 32], sizes = [8, 32], strides = [1, 1]} : vector<32x96xf32> to vector<8x32xf32>
    %26 = vector.extract_strided_slice %24 {offsets = [0, 0], sizes = [8, 8], strides = [1, 1]} : vector<8x32xf32> to vector<8x8xf32>
    %27 = vector.extract_strided_slice %25 {offsets = [0, 0], sizes = [8, 8], strides = [1, 1]} : vector<8x32xf32> to vector<8x8xf32>
    %cst_13 = arith.constant dense<0.000000e+00> : vector<8x8xf32>
    %28 = tpu.matmul %26, %27, %cst_13 {dimension_numbers = #tpu.dot_dimension_numbers<[1], [1], [0], [0], [0, 0, 1, 0], [], []>} : vector<8x8xf32>, vector<8x8xf32>, vector<8x8xf32> -> vector<8x8xf32>
    %29 = vector.extract_strided_slice %24 {offsets = [0, 8], sizes = [8, 8], strides = [1, 1]} : vector<8x32xf32> to vector<8x8xf32>
    %30 = vector.extract_strided_slice %25 {offsets = [0, 8], sizes = [8, 8], strides = [1, 1]} : vector<8x32xf32> to vector<8x8xf32>
    %cst_14 = arith.constant dense<0.000000e+00> : vector<8x8xf32>
    %31 = tpu.matmul %29, %30, %cst_14 {dimension_numbers = #tpu.dot_dimension_numbers<[1], [1], [0], [0], [0, 0, 1, 0], [], []>} : vector<8x8xf32>, vector<8x8xf32>, vector<8x8xf32> -> vector<8x8xf32>
    %32 = vector.extract_strided_slice %24 {offsets = [0, 16], sizes = [8, 8], strides = [1, 1]} : vector<8x32xf32> to vector<8x8xf32>
    %33 = vector.extract_strided_slice %25 {offsets = [0, 16], sizes = [8, 8], strides = [1, 1]} : vector<8x32xf32> to vector<8x8xf32>
    %cst_15 = arith.constant dense<0.000000e+00> : vector<8x8xf32>
    %34 = tpu.matmul %32, %33, %cst_15 {dimension_numbers = #tpu.dot_dimension_numbers<[1], [1], [0], [0], [0, 0, 1, 0], [], []>} : vector<8x8xf32>, vector<8x8xf32>, vector<8x8xf32> -> vector<8x8xf32>
    %35 = vector.extract_strided_slice %24 {offsets = [0, 24], sizes = [8, 8], strides = [1, 1]} : vector<8x32xf32> to vector<8x8xf32>
    %36 = vector.extract_strided_slice %25 {offsets = [0, 24], sizes = [8, 8], strides = [1, 1]} : vector<8x32xf32> to vector<8x8xf32>
    %cst_16 = arith.constant dense<0.000000e+00> : vector<8x8xf32>
    %37 = tpu.matmul %35, %36, %cst_16 {dimension_numbers = #tpu.dot_dimension_numbers<[1], [1], [0], [0], [0, 0, 1, 0], [], []>} : vector<8x8xf32>, vector<8x8xf32>, vector<8x8xf32> -> vector<8x8xf32>
    %38 = tpu.concatenate %14, %17, %20, %23, %28, %31, %34, %37 in 0 : vector<8x8xf32>, vector<8x8xf32>, vector<8x8xf32>, vector<8x8xf32>, vector<8x8xf32>, vector<8x8xf32>, vector<8x8xf32>, vector<8x8xf32> -> vector<64x8xf32>
    %cst_17 = arith.constant dense<0xFF800000> : vector<64xf32>
    %39 = vector.multi_reduction <maximumf>, %38, %cst_17 [1] : vector<64x8xf32> to vector<64xf32>
    %40 = vector.shape_cast %39 : vector<64xf32> to vector<64x1xf32>
    %41 = vector.broadcast %40 : vector<64x1xf32> to vector<64x8xf32>
    %42 = arith.subf %38, %41 : vector<64x8xf32>
    %43 = math.exp %42 : vector<64x8xf32>
    %cst_18 = arith.constant dense<0.000000e+00> : vector<64xf32>
    %44 = vector.multi_reduction <add>, %43, %cst_18 [1] : vector<64x8xf32> to vector<64xf32>
    %45 = vector.shape_cast %44 : vector<64xf32> to vector<64x1xf32>
    %46 = vector.broadcast %45 : vector<64x1xf32> to vector<64x8xf32>
    %47 = arith.divf %43, %46 : vector<64x8xf32>
    %48 = vector.extract_strided_slice %9 {offsets = [8, 64], sizes = [8, 32], strides = [1, 1]} : vector<32x96xf32> to vector<8x32xf32>
    %49 = vector.extract_strided_slice %47 {offsets = [0, 0], sizes = [8, 8], strides = [1, 1]} : vector<64x8xf32> to vector<8x8xf32>
    %50 = vector.extract_strided_slice %48 {offsets = [0, 0], sizes = [8, 8], strides = [1, 1]} : vector<8x32xf32> to vector<8x8xf32>
    %cst_19 = arith.constant dense<0.000000e+00> : vector<8x8xf32>
    %51 = tpu.matmul %49, %50, %cst_19 {dimension_numbers = #tpu.dot_dimension_numbers<[1], [0], [0], [1], [0, 0, 1, 1], [], []>} : vector<8x8xf32>, vector<8x8xf32>, vector<8x8xf32> -> vector<8x8xf32>
    %52 = vector.extract_strided_slice %47 {offsets = [8, 0], sizes = [8, 8], strides = [1, 1]} : vector<64x8xf32> to vector<8x8xf32>
    %53 = vector.extract_strided_slice %48 {offsets = [0, 8], sizes = [8, 8], strides = [1, 1]} : vector<8x32xf32> to vector<8x8xf32>
    %cst_20 = arith.constant dense<0.000000e+00> : vector<8x8xf32>
    %54 = tpu.matmul %52, %53, %cst_20 {dimension_numbers = #tpu.dot_dimension_numbers<[1], [0], [0], [1], [0, 0, 1, 1], [], []>} : vector<8x8xf32>, vector<8x8xf32>, vector<8x8xf32> -> vector<8x8xf32>
    %55 = vector.extract_strided_slice %47 {offsets = [16, 0], sizes = [8, 8], strides = [1, 1]} : vector<64x8xf32> to vector<8x8xf32>
    %56 = vector.extract_strided_slice %48 {offsets = [0, 16], sizes = [8, 8], strides = [1, 1]} : vector<8x32xf32> to vector<8x8xf32>
    %cst_21 = arith.constant dense<0.000000e+00> : vector<8x8xf32>
    %57 = tpu.matmul %55, %56, %cst_21 {dimension_numbers = #tpu.dot_dimension_numbers<[1], [0], [0], [1], [0, 0, 1, 1], [], []>} : vector<8x8xf32>, vector<8x8xf32>, vector<8x8xf32> -> vector<8x8xf32>
    %58 = vector.extract_strided_slice %47 {offsets = [24, 0], sizes = [8, 8], strides = [1, 1]} : vector<64x8xf32> to vector<8x8xf32>
    %59 = vector.extract_strided_slice %48 {offsets = [0, 24], sizes = [8, 8], strides = [1, 1]} : vector<8x32xf32> to vector<8x8xf32>
    %cst_22 = arith.constant dense<0.000000e+00> : vector<8x8xf32>
    %60 = tpu.matmul %58, %59, %cst_22 {dimension_numbers = #tpu.dot_dimension_numbers<[1], [0], [0], [1], [0, 0, 1, 1], [], []>} : vector<8x8xf32>, vector<8x8xf32>, vector<8x8xf32> -> vector<8x8xf32>
    %61 = tpu.concatenate %51, %54, %57, %60 in 1 : vector<8x8xf32>, vector<8x8xf32>, vector<8x8xf32>, vector<8x8xf32> -> vector<8x32xf32>
    %62 = vector.extract_strided_slice %9 {offsets = [24, 64], sizes = [8, 32], strides = [1, 1]} : vector<32x96xf32> to vector<8x32xf32>
    %63 = vector.extract_strided_slice %47 {offsets = [32, 0], sizes = [8, 8], strides = [1, 1]} : vector<64x8xf32> to vector<8x8xf32>
    %64 = vector.extract_strided_slice %62 {offsets = [0, 0], sizes = [8, 8], strides = [1, 1]} : vector<8x32xf32> to vector<8x8xf32>
    %cst_23 = arith.constant dense<0.000000e+00> : vector<8x8xf32>
    %65 = tpu.matmul %63, %64, %cst_23 {dimension_numbers = #tpu.dot_dimension_numbers<[1], [0], [0], [1], [0, 0, 1, 1], [], []>} : vector<8x8xf32>, vector<8x8xf32>, vector<8x8xf32> -> vector<8x8xf32>
    %66 = vector.extract_strided_slice %47 {offsets = [40, 0], sizes = [8, 8], strides = [1, 1]} : vector<64x8xf32> to vector<8x8xf32>
    %67 = vector.extract_strided_slice %62 {offsets = [0, 8], sizes = [8, 8], strides = [1, 1]} : vector<8x32xf32> to vector<8x8xf32>
    %cst_24 = arith.constant dense<0.000000e+00> : vector<8x8xf32>
    %68 = tpu.matmul %66, %67, %cst_24 {dimension_numbers = #tpu.dot_dimension_numbers<[1], [0], [0], [1], [0, 0, 1, 1], [], []>} : vector<8x8xf32>, vector<8x8xf32>, vector<8x8xf32> -> vector<8x8xf32>
    %69 = vector.extract_strided_slice %47 {offsets = [48, 0], sizes = [8, 8], strides = [1, 1]} : vector<64x8xf32> to vector<8x8xf32>
    %70 = vector.extract_strided_slice %62 {offsets = [0, 16], sizes = [8, 8], strides = [1, 1]} : vector<8x32xf32> to vector<8x8xf32>
    %cst_25 = arith.constant dense<0.000000e+00> : vector<8x8xf32>
    %71 = tpu.matmul %69, %70, %cst_25 {dimension_numbers = #tpu.dot_dimension_numbers<[1], [0], [0], [1], [0, 0, 1, 1], [], []>} : vector<8x8xf32>, vector<8x8xf32>, vector<8x8xf32> -> vector<8x8xf32>
    %72 = vector.extract_strided_slice %47 {offsets = [56, 0], sizes = [8, 8], strides = [1, 1]} : vector<64x8xf32> to vector<8x8xf32>
    %73 = vector.extract_strided_slice %62 {offsets = [0, 24], sizes = [8, 8], strides = [1, 1]} : vector<8x32xf32> to vector<8x8xf32>
    %cst_26 = arith.constant dense<0.000000e+00> : vector<8x8xf32>
    %74 = tpu.matmul %72, %73, %cst_26 {dimension_numbers = #tpu.dot_dimension_numbers<[1], [0], [0], [1], [0, 0, 1, 1], [], []>} : vector<8x8xf32>, vector<8x8xf32>, vector<8x8xf32> -> vector<8x8xf32>
    %75 = tpu.concatenate %65, %68, %71, %74 in 1 : vector<8x8xf32>, vector<8x8xf32>, vector<8x8xf32>, vector<8x8xf32> -> vector<8x32xf32>
    %76 = tpu.concatenate %61, %75 in 0 : vector<8x32xf32>, vector<8x32xf32> -> vector<16x32xf32>
    %c0_27 = arith.constant 0 : index
    %c0_28 = arith.constant 0 : index
    %77 = vector.load %arg3[%c0_27, %c0_28] : memref<32x32xf32, #tpu.memory_space<vmem>>, vector<32x32xf32>
    %cst_29 = arith.constant dense<0.000000e+00> : vector<16x32xf32>
    %78 = tpu.matmul %76, %77, %cst_29 {dimension_numbers = #tpu.dot_dimension_numbers<[1], [0], [0], [1], [0, 0, 1, 1], [], []>} : vector<16x32xf32>, vector<32x32xf32>, vector<16x32xf32> -> vector<16x32xf32>
    %c0_30 = arith.constant 0 : index
    %c0_31 = arith.constant 0 : index
    %79 = vector.load %arg5[%c0_30, %c0_31] : memref<1x32xf32, #tpu.memory_space<vmem>>, vector<1x32xf32>
    %80 = vector.broadcast %79 : vector<1x32xf32> to vector<16x32xf32>
    %81 = arith.addf %78, %80 : vector<16x32xf32>
    %82 = vector.shape_cast %81 : vector<16x32xf32> to vector<2x8x32xf32>
    %c0_32 = arith.constant 0 : index
    %c0_33 = arith.constant 0 : index
    %c0_34 = arith.constant 0 : index
    %83 = vector.load %arg6[%c0_32, %c0_33, %c0_34] : memref<2x8x32xf32, #tpu.memory_space<vmem>>, vector<2x8x32xf32>
    tpu.vector_store %arg6[%c0_32, %c0_33, %c0_34], %82 {strides = array<i32>} : memref<2x8x32xf32, #tpu.memory_space<vmem>>, vector<2x8x32xf32>,
    %84 = vector.shape_cast %47 : vector<64x8xf32> to vector<2x4x8x8xf32>
    %cst_35 = arith.constant dense<0.000000e+00> : vector<2x8x8xf32>
    %85 = vector.multi_reduction <add>, %84, %cst_35 [1] : vector<2x4x8x8xf32> to vector<2x8x8xf32>
    %cst_36 = arith.constant 4.000000e+00 : f32
    %86 = vector.broadcast %cst_36 : f32 to vector<2x8x8xf32>
    %87 = arith.divf %85, %86 : vector<2x8x8xf32>
    %c0_37 = arith.constant 0 : index
    %c0_38 = arith.constant 0 : index
    %c0_39 = arith.constant 0 : index
    %88 = vector.load %arg7[%c0_37, %c0_38, %c0_39] : memref<2x8x8xf32, #tpu.memory_space<vmem>>, vector<2x8x8xf32>
    tpu.vector_store %arg7[%c0_37, %c0_38, %c0_39], %87 {strides = array<i32>} : memref<2x8x8xf32, #tpu.memory_space<vmem>>, vector<2x8x8xf32>,
    return
  }
}

</mosaic_0001>

<bundles_post_ra>
// kernel: tpu_custom_call.1
= control target key start
LH: loop header
LB: loop body
LE: loop exit
PB: predicated region body
PF: predicated region fallthrough
CT: control target
= control target key end

     0   :  { %13 = vsyncpa [#allocation3], 0  ;;  %s1430_s0 = inlined_call_operand.hbm [shape: f32[2,16,32], index: 0, kind: input, shape index: {}]   ;;  %s1431_s1 = inlined_call_operand.hbm [shape: f32[2,1,32], index: 1, kind: input, shape index: {}]   ;;  %s1432_s2 = inlined_call_operand.hbm [shape: f32[32,96], index: 2, kind: input, shape index: {}]   ;;  %s1433_s3 = inlined_call_operand.hbm [shape: f32[32,32], index: 3, kind: input, shape index: {}]   ;;  %s1434_s4 = inlined_call_operand.vmem [shape: f32[1,96], index: 4, kind: input, shape index: {}]   ;;  %s1435_s5 = inlined_call_operand.vmem [shape: f32[1,32], index: 5, kind: input, shape index: {}]   ;;  %s1436_s6 = inlined_call_operand.hbm [shape: f32[2,8,32], index: 6, kind: output, shape index: {0}]   ;;  %s1437_s7 = inlined_call_operand.hbm [shape: f32[2,8,8], index: 7, kind: output, shape index: {1}]  }
   0x1   :  { %14 = vsyncpa [#allocation6], 0 }
   0x2   :  { %15 = vsyncpa [#allocation9], 0 }
   0x3   :  { %16 = vsyncpa [#allocation4], 0  ;;  %s35_s26 = sshll.u32 %s1431_s1, 4  ;;  %s36_s26 = int_to_ptr.hbm [resolvable:$true] %s35_s26 }
   0x4   :  { %17 = vsyncpa [#allocation12], 0  ;;  %s1166_s27 = smov [#allocation5]   ;;  %s22_s8 = sshll.u32 %s1430_s0, 4  ;;  %s23_s8 = int_to_ptr.hbm [resolvable:$true] %s22_s8 }
   0x5   :  { %s37_s28 = sshll.u32 %s1166_s27, 4  ;;  %s1167_s9 = smov 16   ;;  %s38_s28 = int_to_ptr.vmem [resolvable:$true] %s37_s28 }
   0x6   :  { %s1168_s10 = smov 1   ;;  %s1169_s11 = smov [#allocation2]  }
   0x7   :  { %43 = dma.hbm_to_vmem [thread:$0]  %s36_s26, 32, %s38_s28, [#allocation6], %s1167_s9, %s1167_s9, %s1168_s10  }
   0x8   :  { %s24_s12 = sshll.u32 %s1169_s11, 4  ;;  %s1170_s13 = smov 128   ;;  %s25_s12 = int_to_ptr.vmem [resolvable:$true] %s24_s12 }
   0x9   :  { %s1171_s1 = smov 8   ;;  %s48_s16 = sshll.u32 %s1432_s2, 4  ;;  %s49_s16 = int_to_ptr.hbm [resolvable:$true] %s48_s16 }
   0xa   :  { %30 = dma.hbm_to_vmem [thread:$0]  %s23_s8, 512, %s25_s12, [#allocation3], %s1170_s13, %s1170_s13, %s1171_s1  }
   0xb   :  { %s1172_s0 = smov [#allocation7]   ;;  %s61_s20 = sshll.u32 %s1433_s3, 4  ;;  %s62_s20 = int_to_ptr.hbm [resolvable:$true] %s61_s20 }
   0xc   :  { %s50_s17 = sshll.u32 %s1172_s0, 4  ;;  %s1173_s21 = smov [#allocation8]   ;;  %s51_s17 = int_to_ptr.vmem [resolvable:$true] %s50_s17 }
   0xd   :  { %56 = dma.hbm_to_vmem [thread:$0]  %s49_s16, 512, %s51_s17, [#allocation6], %s1170_s13, %s1170_s13, %s1171_s1  }
   0xe   :  { %s63_s22 = sshll.u32 %s1173_s21, 4  ;;  %s64_s22 = int_to_ptr.vmem [resolvable:$true] %s63_s22 }
   0xf   :  { %69 = dma.hbm_to_vmem [thread:$0]  %s62_s20, 512, %s64_s22, [#allocation9], %s1170_s13, %s1170_s13, %s1171_s1  }
  0x10   :  { %1156 = dma.done.wait [#allocation3], 512  }
  0x11   :  { %1157 = vsyncadd [#allocation3], 4294966784 }
  0x12   :  { %1158 = dma.done.wait [#allocation6], 544  }
  0x13   :  { %1159 = vsyncadd [#allocation6], 4294966752 }
  0x14   :  { %1160 = dma.done.wait [#allocation9], 512  }
  0x15   :  { %1161 = vsyncadd [#allocation9], 4294966784  ;;  %v109_v0 = vld [vmem:[#allocation7 + $0x18] sm:$0xff]  ;;  %v108_v1 = vld [vmem:[#allocation7 + $0x10] sm:$0xff]  ;;  %vm114_vm0 = vcmask 261120   ;;  %s1174_s23 = smov 112  }
  0x16   :  { %139 = vmatpush.msra.mxu0 %v109_v0  ;;  %v90_v2 = vld [vmem:[#allocation2] sm:$0xff]  ;;  %v107_v3 = vld [vmem:[#allocation7 + $0x8] sm:$0xff]  ;;  %v93_v12 = vld [vmem:[#allocation2 + $0x18] sm:$0xff]  ;;  %s1175_s24 = smov 120   ;;  %s1176_s25 = smov 96   ;;  %vm159_vm1 = vcmask 64512  }
  0x17   :  { %v974_v4 = vld [vmem:[#allocation5] ss:$0 sm:$0xff]  ;;  %v106_v5 = vld [vmem:[#allocation7] sm:$0xff]  ;;  %v975_v9 = vld [vmem:[#allocation5 + $0x1] ss:$0 sm:$0xff]  ;;  %s1177_s26 = smov 72  }
  0x18   :  { %140 = vmatpush.msra.mxu0 %v108_v1  ;;  %v102_v6 = vadd.f32 %v974_v4, %v90_v2  ;;  %v91_v7 = vld [vmem:[#allocation2 + $0x8] sm:$0xff]  ;;  %v92_v10 = vld [vmem:[#allocation2 + $0x10] sm:$0xff]  ;;  %v105_v13 = vadd.f32 %v975_v9, %v93_v12  ;;  %v976_v14 = vld [vmem:[%s1434_s4] ss:$0 sm:$0xff]  ;;  %s1178_s27 = smov 80   ;;  %s1179_s4 = smov 88  }
  0x19   :  { %v103_v8 = vadd.f32 %v974_v4, %v91_v7  ;;  %v104_v11 = vadd.f32 %v975_v9, %v92_v10  ;;  %s1180_s28 = smov 104   ;;  %s1181_s29 = smov 64  }
  0x1a   :  { %141 = vmatpush.msra.mxu0 %v107_v3  ;;  %s1182_s30 = smov 48   ;;  %s1183_s8 = smov 56  }
  0x1b   :  { %s1184_s10 = smov 40   ;;  %s1186_s11 = smov 24  }
  0x1c   :  { %142 = vmatpush.msra.mxu0 %v106_v5  ;;  %s896_s16 = sshll.u32 %s1437_s7, 4  ;;  %s1188_s18 = smov [#allocation10]   ;;  %s897_s16 = int_to_ptr.hbm [resolvable:$true] %s896_s16 }
  0x1d   :  { %916 = vmatmul.msk.f32.vlgmr.msra.gmra.mxu0 %vm114_vm0, %v102_v6  ;;  %s881_s19 = sshll.u32 %s1188_s18, 4  ;;  %s883_s7 = sshll.u32 %s1436_s6, 4  ;;  %s882_s19 = int_to_ptr.vmem [resolvable:$true] %s881_s19  ;;  %s884_s7 = int_to_ptr.hbm [resolvable:$true] %s883_s7 }
  0x25   :  { %917 = vmatmul.msk.f32.gmra.mxu0 %vm114_vm0, %v103_v8 }
  0x2d   :  { %918 = vmatmul.msk.f32.gmra.mxu0 %vm114_vm0, %v104_v11 }
  0x35   :  { %919 = vmatmul.msk.f32.gmra.mxu0 %vm114_vm0, %v105_v13 }
  0x9a   :  { %v144_v15 = vpop.f32.mrf.mxu0 }
  0x9b   :  { %v145_v16 = vadd.f32 %v976_v14, %v144_v15 }
  0x9d   :  { %213 = vrot.lane.b32.xlu2 %v145_v16, %s1174_s23  ;;  %185 = vrot.lane.b32.xlu1 %v145_v16, %s1175_s24 }
  0xa2   :  { %v147_v17 = vpop.f32.mrf.mxu0 }
  0xa3   :  { %v1259_v18 = vadd.f32 %v976_v14, %v147_v17 }
  0xa5   :  { %157 = vrot.lane.b32.xlu0 %v1259_v18, %s1176_s25  ;;  %243 = vrot.lane.b32.xlu2 %v1259_v18, %s1177_s26 }
  0xa6   :  { %215 = vrot.lane.b32.xlu1 %v1259_v18, %s1178_s27 }
  0xaa   :  { %v150_v19 = vpop.f32.mrf.mxu0 }
  0xab   :  { %v151_v22 = vadd.f32 %v976_v14, %v150_v19 }
  0xad   :  { %187 = vrot.lane.b32.xlu0 %v1259_v18, %s1179_s4  ;;  %241 = vrot.lane.b32.xlu2 %v145_v16, %s1180_s28 }
  0xb2   :  { %v153_v20 = vpop.f32.mrf.mxu0 }
  0xb3   :  { %v1265_v21 = vadd.f32 %v976_v14, %v153_v20 }
  0xb5   :  { %270 = vrot.lane.b32.xlu0 %v1265_v21, %s1176_s25  ;;  %355 = vrot.lane.b32.xlu2 %v1265_v21, %s1177_s26 }
  0xb6   :  { %299 = vrot.lane.b32.xlu1 %v1265_v21, %s1179_s4 }
  0xbd   :  { %297 = vrot.lane.b32.xlu0 %v151_v22, %s1175_s24 }
  0xbe   :  { %327 = vrot.lane.b32.xlu1 %v1265_v21, %s1178_s27 }
  0xc5   :  { %325 = vrot.lane.b32.xlu0 %v151_v22, %s1174_s23 }
  0xc6   :  { %353 = vrot.lane.b32.xlu1 %v151_v22, %s1180_s28 }
  0xf7   :  { %v214_v23 = vpop.permute.xlu2 %213 }
  0xff   :  { %v244_v24 = vpop.permute.xlu2 %243 }
 0x100   :  { %926 = vmatpush.xpose.msk.msra.mxu1 %vm159_vm1, %v244_v24 }
 0x107   :  { %v242_v25 = vpop.permute.xlu2 %241 }
 0x108   :  { %927 = vmatmul.msk.f32.vlgmr.msra.gmra.mxu1 %vm159_vm1, %v242_v25 }
 0x10f   :  { %v186_v26 = vpop.permute.xlu1 %185  ;;  %v356_v31 = vpop.permute.xlu2 %355 }
 0x117   :  { %v158_v27 = vpop.permute.xlu0 %157 }
 0x118   :  { %v216_v28 = vpop.permute.xlu1 %215  ;;  %920 = vmatpush.xpose.msk.msra.mxu2 %vm159_vm1, %v158_v27 }
 0x119   :  { %924 = vmatpush.xpose.msk.msra.mxu3 %vm159_vm1, %v216_v28 }
 0x11b   :  { %921 = vmatmul.msk.f32.vlgmr.msra.gmra.mxu2 %vm159_vm1, %v145_v16 }
 0x11c   :  { %925 = vmatmul.msk.f32.vlgmr.msra.gmra.mxu3 %vm159_vm1, %v214_v23 }
 0x11f   :  { %v188_v29 = vpop.permute.xlu0 %187 }
 0x120   :  { %922 = vmatpush.xpose.msk.msrb.mxu2 %vm159_vm1, %v188_v29 }
 0x123   :  { %923 = vmatmul.msk.f32.vlgmr.msrb.gmra.mxu2 %vm159_vm1, %v186_v26  ;;  %v969_v26 = vpack.i.bf16 %v1265_v21, %v1259_v18 }
 0x127   :  { %v271_v30 = vpop.permute.xlu0 %270 }
 0x128   :  { %v300_v32 = vpop.permute.xlu1 %299  ;;  %928 = vmatpush.xpose.msk.msra.mxu2 %vm159_vm1, %v271_v30 }
 0x129   :  { %930 = vmatpush.xpose.msk.msrb.mxu3 %vm159_vm1, %v300_v32 }
 0x12b   :  { %929 = vmatmul.msk.f32.vlgmr.msra.gmra.mxu2 %vm159_vm1, %v151_v22 }
 0x12c   :  { %934 = vmatpush.xpose.msk.msrb.mxu2 %vm159_vm1, %v356_v31 }
 0x12f   :  { %v298_v33 = vpop.permute.xlu0 %297 }
 0x130   :  { %v328_v34 = vpop.permute.xlu1 %327  ;;  %931 = vmatmul.msk.f32.vlgmr.msrb.gmra.mxu3 %vm159_vm1, %v298_v33 }
 0x131   :  { %932 = vmatpush.xpose.msk.msrb.mxu1 %vm159_vm1, %v328_v34 }
 0x137   :  { %v326_v35 = vpop.permute.xlu0 %325 }
 0x138   :  { %v354_v36 = vpop.permute.xlu1 %353  ;;  %933 = vmatmul.msk.f32.vlgmr.msrb.gmra.mxu1 %vm159_vm1, %v326_v35 }
 0x139   :  { %935 = vmatmul.msk.f32.vlgmr.msrb.gmra.mxu2 %vm159_vm1, %v354_v36 }
 0x185   :  { %v266_v37 = vpop.f32.mrf.mxu1 }
 0x186   :  { %v390_v38 = vsel %vm159_vm1, %v266_v37, -inf }
 0x187   :  { %391 = vmax.xlane.f32.xlu1 %v390_v38 }
 0x19e   :  { %v182_v39 = vpop.f32.mrf.mxu2 }
 0x19f   :  { %v238_v40 = vpop.f32.mrf.mxu3  ;;  %v381_v41 = vsel %vm159_vm1, %v182_v39, -inf }
 0x1a0   :  { %v387_v42 = vsel %vm159_vm1, %v238_v40, -inf  ;;  %382 = vmax.xlane.f32.xlu2 %v381_v41 }
 0x1a1   :  { %388 = vmax.xlane.f32.xlu0 %v387_v42  ;;  %v1185_v42 = vmov 4.0  }
 0x1a6   :  { %v210_v43 = vpop.f32.mrf.mxu2 }
 0x1a7   :  { %v384_v44 = vsel %vm159_vm1, %v210_v43, -inf }
 0x1a8   :  { %385 = vmax.xlane.f32.xlu2 %v384_v44 }
 0x1ae   :  { %v1291_v45 = vpop.f32.mrf.mxu2 }
 0x1af   :  { %v393_v46 = vsel %vm159_vm1, %v1291_v45, -inf }
 0x1b0   :  { %394 = vmax.xlane.f32.xlu1 %v393_v46 }
 0x1b3   :  { %v322_v47 = vpop.f32.mrf.mxu3 }
 0x1b4   :  { %v396_v48 = vsel %vm159_vm1, %v322_v47, -inf }
 0x1b5   :  { %v350_v49 = vpop.f32.mrf.mxu1  ;;  %397 = vmax.xlane.f32.xlu2 %v396_v48 }
 0x1b6   :  { %v399_v50 = vsel %vm159_vm1, %v350_v49, -inf }
 0x1b7   :  { %400 = vmax.xlane.f32.xlu0 %v399_v50 }
 0x1bc   :  { %v378_v51 = vpop.f32.mrf.mxu2 }
 0x1bd   :  { %v402_v52 = vsel %vm159_vm1, %v378_v51, -inf }
 0x1be   :  { %403 = vmax.xlane.f32.xlu1 %v402_v52 }
 0x1cb   :  { %573 = vrot.lane.b32.xlu0 %v1259_v18, %s1181_s29 }
 0x1cd   :  { %625 = vrot.lane.b32.xlu2 %v1259_v18, %s1182_s30 }
 0x1fa   :  { %v392_v53 = vpop.xlane.xlu1 %391 }
 0x1fb   :  { %v408_v54 = vsub.f32 %v266_v37, %v392_v53 }
 0x1fd   :  { %v419_v55 = vmul.f32 1.442695, %v408_v54 }
 0x1ff   :  { %978 = vpow2.f32 %v419_v55 }
 0x205   :  { %v1302_v56 = vpop.eup %978 }
 0x206   :  { %v438_v57 = vsel %vm159_vm1, %v1302_v56, 0.0 }
 0x207   :  { %439 = vadd.xlane.f32.xlu2 %v438_v57 }
 0x213   :  { %v383_v58 = vpop.xlane.xlu2 %382 }
 0x214   :  { %v389_v59 = vpop.xlane.xlu0 %388  ;;  %v405_v60 = vsub.f32 %v182_v39, %v383_v58 }
 0x215   :  { %v407_v61 = vsub.f32 %v238_v40, %v389_v59 }
 0x216   :  { %v413_v62 = vmul.f32 1.442695, %v405_v60 }
 0x217   :  { %v417_v63 = vmul.f32 1.442695, %v407_v61 }
 0x218   :  { %980 = vpow2.f32 %v413_v62 }
 0x219   :  { %982 = vpow2.f32 %v417_v63 }
 0x21b   :  { %v386_v0 = vpop.xlane.xlu2 %385 }
 0x21c   :  { %v406_v1 = vsub.f32 %v210_v43, %v386_v0 }
 0x21e   :  { %v1306_v2 = vpop.eup %980  ;;  %v415_v3 = vmul.f32 1.442695, %v406_v1 }
 0x21f   :  { %v1308_v4 = vpop.eup %982  ;;  %v429_v5 = vsel %vm159_vm1, %v1306_v2, 0.0 }
 0x220   :  { %984 = vpow2.f32 %v415_v3  ;;  %v435_v6 = vsel %vm159_vm1, %v1308_v4, 0.0  ;;  %430 = vadd.xlane.f32.xlu2 %v429_v5 }
 0x221   :  { %436 = vadd.xlane.f32.xlu0 %v435_v6 }
 0x223   :  { %v395_v10 = vpop.xlane.xlu1 %394 }
 0x224   :  { %v409_v30 = vsub.f32 %v1291_v45, %v395_v10 }
 0x226   :  { %v1314_v7 = vpop.eup %984  ;;  %v421_v31 = vmul.f32 1.442695, %v409_v30 }
 0x227   :  { %v432_v8 = vsel %vm159_vm1, %v1314_v7, 0.0 }
 0x228   :  { %v398_v9 = vpop.xlane.xlu2 %397 }
 0x229   :  { %433 = vadd.xlane.f32.xlu0 %v432_v8  ;;  %v410_v11 = vsub.f32 %v322_v47, %v398_v9 }
 0x22a   :  { %v401_v12 = vpop.xlane.xlu0 %400 }
 0x22b   :  { %v423_v13 = vmul.f32 1.442695, %v410_v11  ;;  %v411_v14 = vsub.f32 %v350_v49, %v401_v12 }
 0x22d   :  { %986 = vpow2.f32 %v423_v13  ;;  %v425_v15 = vmul.f32 1.442695, %v411_v14 }
 0x22f   :  { %988 = vpow2.f32 %v425_v15 }
 0x230   :  { %v626_v16 = vpop.permute.xlu2 %625 }
 0x231   :  { %v404_v17 = vpop.xlane.xlu1 %403  ;;  %646 = vmatpush.msra.mxu2 %v626_v16 }
 0x232   :  { %v412_v19 = vsub.f32 %v378_v51, %v404_v17 }
 0x233   :  { %v1318_v20 = vpop.eup %986 }
 0x234   :  { %v427_v22 = vmul.f32 1.442695, %v412_v19  ;;  %v444_v23 = vsel %vm159_vm1, %v1318_v20, 0.0 }
 0x235   :  { %v1322_v24 = vpop.eup %988  ;;  %445 = vadd.xlane.f32.xlu1 %v444_v23 }
 0x236   :  { %990 = vpow2.f32 %v427_v22  ;;  %v447_v25 = vsel %vm159_vm1, %v1322_v24, 0.0 }
 0x237   :  { %448 = vadd.xlane.f32.xlu2 %v447_v25  ;;  %992 = vpow2.f32 %v421_v31 }
 0x23c   :  { %v1328_v27 = vpop.eup %990 }
 0x23d   :  { %970 = vrot.lane.b32.xlu0 %v969_v26, %s1183_s8  ;;  %v574_v28 = vpop.permute.xlu0 %573  ;;  %v450_v29 = vsel %vm159_vm1, %v1328_v27, 0.0  ;;  %v1339_v32 = vpop.eup %992 }
 0x23e   :  { %451 = vadd.xlane.f32.xlu1 %v450_v29  ;;  %594 = vmatpush.msra.mxu3 %v574_v28  ;;  %v441_v33 = vsel %vm159_vm1, %v1339_v32, 0.0 }
 0x245   :  { %746 = vrot.lane.b32.xlu0 %v1265_v21, %s1182_s30 }
 0x24d   :  { %694 = vrot.lane.b32.xlu0 %v1265_v21, %s1181_s29 }
 0x24f   :  { %772 = vrot.lane.b32.xlu2 %v1265_v21, %s1184_s10 }
 0x257   :  { %651 = vrot.lane.b32.xlu1 %v1259_v18, %s1184_s10 }
 0x27a   :  { %v1343_v34 = vpop.xlane.xlu2 %439 }
 0x27b   :  { %994 = vrcp.f32 %v1343_v34  ;;  %v509_v10 = vand.u32 2147483648, %v1343_v34  ;;  %vm503_vm12 = vweird.f32 %v1343_v34 }
 0x27d   :  { %v510_v19 = vor.u32 1.1754944e-38, %v509_v10 }
 0x281   :  { %442 = vadd.xlane.f32.xlu1 %v441_v33  ;;  %v1346_v21 = vpop.eup %994 }
 0x282   :  { %v499_v37 = vmul.f32 %v1346_v21, %v1343_v34  ;;  %vm504_vm10 = vweird.f32 %v1346_v21 }
 0x283   :  { %vm505_vm13 = vmor %vm503_vm12, %vm504_vm10 }
 0x284   :  { %v500_v44 = vsub.f32 1.0, %v499_v37 }
 0x286   :  { %v501_v58 = vmul.f32 %v1346_v21, %v500_v44 }
 0x288   :  { %v502_v8 = vadd.f32 %v1346_v21, %v501_v58 }
 0x28a   :  { %v506_v16 = vsel %vm505_vm13, %v1346_v21, %v502_v8 }
 0x293   :  { %v431_v35 = vpop.xlane.xlu2 %430 }
 0x294   :  { %v437_v36 = vpop.xlane.xlu0 %436  ;;  %996 = vrcp.f32 %v431_v35  ;;  %v464_v46 = vand.u32 2147483648, %v431_v35  ;;  %v462_v49 = vand.u32 2147483647, %v431_v35  ;;  %vm458_vm4 = vweird.f32 %v431_v35 }
 0x295   :  { %998 = vrcp.f32 %v437_v36  ;;  %v494_v47 = vand.u32 2147483648, %v437_v36  ;;  %v492_v51 = vand.u32 2147483647, %v437_v36  ;;  %vm488_vm5 = vweird.f32 %v437_v36 }
 0x296   :  { %1000 = vrcp.f32 %v1185_v42  ;;  %v465_v55 = vor.u32 1.1754944e-38, %v464_v46  ;;  %vm463_vm8 = vcmp.eq.f32.partialorder %v462_v49, 8.507059e+37 }
 0x297   :  { %v495_v59 = vor.u32 1.1754944e-38, %v494_v47  ;;  %vm493_vm9 = vcmp.eq.f32.partialorder %v492_v51, 8.507059e+37 }
 0x29a   :  { %v997_v18 = vpop.eup %996 }
 0x29b   :  { %v999_v38 = vpop.eup %998  ;;  %v454_v39 = vmul.f32 %v997_v18, %v431_v35  ;;  %vm459_vm2 = vweird.f32 %v997_v18 }
 0x29c   :  { %v484_v40 = vmul.f32 %v999_v38, %v437_v36  ;;  %v434_v41 = vpop.xlane.xlu0 %433  ;;  %vm489_vm3 = vweird.f32 %v999_v38  ;;  %v1350_v53 = vpop.eup %1000  ;;  %vm460_vm6 = vmor %vm458_vm4, %vm459_vm2 }
 0x29d   :  { %v455_v43 = vsub.f32 1.0, %v454_v39  ;;  %1002 = vrcp.f32 %v434_v41  ;;  %vm490_vm7 = vmor %vm488_vm5, %vm489_vm3  ;;  %v867_v6 = vmul.f32 4.0, %v1350_v53  ;;  %v479_v9 = vand.u32 2147483648, %v434_v41 }
 0x29e   :  { %v485_v45 = vsub.f32 1.0, %v484_v40  ;;  %v477_v12 = vand.u32 2147483647, %v434_v41  ;;  %vm473_vm14 = vweird.f32 %v434_v41  ;;  %vm871_vm4 = vweird.f32 %v1350_v53 }
 0x29f   :  { %v456_v48 = vmul.f32 %v997_v18, %v455_v43  ;;  %v868_v15 = vsub.f32 1.0, %v867_v6  ;;  %v480_v17 = vor.u32 1.1754944e-38, %v479_v9 }
 0x2a0   :  { %v486_v50 = vmul.f32 %v999_v38, %v485_v45  ;;  %vm478_vm2 = vcmp.eq.f32.partialorder %v477_v12, 8.507059e+37 }
 0x2a1   :  { %v457_v52 = vadd.f32 %v997_v18, %v456_v48  ;;  %v869_v28 = vmul.f32 %v1350_v53, %v868_v15 }
 0x2a2   :  { %v487_v54 = vadd.f32 %v999_v38, %v486_v50 }
 0x2a3   :  { %v1003_v57 = vpop.eup %1002  ;;  %v461_v60 = vsel %vm460_vm6, %v997_v18, %v457_v52 }
 0x2a4   :  { %v491_v61 = vsel %vm490_vm7, %v999_v38, %v487_v54  ;;  %v466_v62 = vsel %vm463_vm8, %v465_v55, %v461_v60  ;;  %v469_v63 = vmul.f32 %v1003_v57, %v434_v41  ;;  %vm474_vm11 = vweird.f32 %v1003_v57 }
 0x2a5   :  { %v496_v0 = vsel %vm493_vm9, %v495_v59, %v491_v61  ;;  %v467_v1 = vmul.f32 %v1306_v2, %v466_v62  ;;  %vm475_vm15 = vmor %vm473_vm14, %vm474_vm11  ;;  %v870_v38 = vadd.f32 %v1350_v53, %v869_v28 }
 0x2a6   :  { %v470_v3 = vsub.f32 1.0, %v469_v63  ;;  %v497_v5 = vmul.f32 %v1308_v4, %v496_v0  ;;  %v507_v4 = vand.u32 2147483647, %v1343_v34 }
 0x2a7   :  { %936 = vmatmul.msk.f32.vlgmr.msra.gmra.mxu3 %vm159_vm1, %v467_v1  ;;  %v852_v18 = vsel %vm159_vm1, %v467_v1, 0.0  ;;  %v1381_v46 = vsel %vm871_vm4, %v1350_v53, %v870_v38 }
 0x2a8   :  { %v471_v11 = vmul.f32 %v1003_v57, %v470_v3  ;;  %938 = vmatmul.msk.f32.vlgmr.msra.gmra.mxu2 %vm159_vm1, %v497_v5  ;;  %v446_v2 = vpop.xlane.xlu1 %445  ;;  %vm508_vm3 = vcmp.eq.f32.partialorder %v507_v4, 8.507059e+37  ;;  %v855_v41 = vsel %vm159_vm1, %v497_v5, 0.0 }
 0x2a9   :  { %1004 = vrcp.f32 %v446_v2  ;;  %v511_v25 = vsel %vm508_vm3, %v510_v19, %v506_v16  ;;  %v539_v39 = vand.u32 2147483648, %v446_v2  ;;  %v537_v42 = vand.u32 2147483647, %v446_v2 }
 0x2aa   :  { %v472_v13 = vadd.f32 %v1003_v57, %v471_v11  ;;  %v1363_v14 = vpop.xlane.xlu2 %448  ;;  %v1371_v21 = vmul.f32 %v1302_v56, %v511_v25  ;;  %vm533_vm6 = vweird.f32 %v446_v2 }
 0x2ab   :  { %1006 = vrcp.f32 %v1363_v14  ;;  %v540_v48 = vor.u32 1.1754944e-38, %v539_v39  ;;  %vm538_vm8 = vcmp.eq.f32.partialorder %v537_v42, 8.507059e+37  ;;  %v554_v10 = vand.u32 2147483648, %v1363_v14  ;;  %v815_v42 = vld [vmem:[#allocation8 + $0x10] sm:$0xff] }
 0x2ac   :  { %v476_v22 = vsel %vm475_vm15, %v1003_v57, %v472_v13  ;;  %v857_v45 = vsel %vm159_vm1, %v1371_v21, 0.0  ;;  %vm548_vm14 = vweird.f32 %v1363_v14  ;;  %v552_v11 = vand.u32 2147483647, %v1363_v14 }
 0x2ad   :  { %v481_v23 = vsel %vm478_vm2, %v480_v17, %v476_v22  ;;  %v555_v4 = vor.u32 1.1754944e-38, %v554_v10 }
 0x2ae   :  { %v482_v26 = vmul.f32 %v1314_v7, %v481_v23  ;;  %vm553_vm2 = vcmp.eq.f32.partialorder %v552_v11, 8.507059e+37 }
 0x2af   :  { %v1005_v29 = vpop.eup %1004  ;;  %v971_v30 = vpop.permute.xlu0 %970 }
 0x2b0   :  { %v529_v31 = vmul.f32 %v1005_v29, %v446_v2  ;;  %v973_v33 = vunpack.i.h.bf16 %v971_v30  ;;  %v972_v34 = vunpack.i.l.bf16 %v971_v30  ;;  %v853_v36 = vsel %vm159_vm1, %v482_v26, 0.0 }
 0x2b1   :  { %v452_v35 = vpop.xlane.xlu1 %451  ;;  %v854_v40 = vadd.f32 %v853_v36, %v852_v18  ;;  %vm534_vm5 = vweird.f32 %v1005_v29  ;;  %v1007_v47 = vpop.eup %1006 }
 0x2b2   :  { %v530_v37 = vsub.f32 1.0, %v529_v31  ;;  %1008 = vrcp.f32 %v452_v35  ;;  %620 = vmatpush.msra.mxu1 %v972_v34  ;;  %741 = vmatpush.msrb.mxu2 %v973_v33  ;;  %v773_v7 = vpop.permute.xlu2 %772  ;;  %vm535_vm7 = vmor %vm533_vm6, %vm534_vm5  ;;  %v544_v59 = vmul.f32 %v1007_v47, %v1363_v14  ;;  %v569_v53 = vand.u32 2147483648, %v452_v35 }
 0x2b3   :  { %937 = vmatmul.msk.f32.vlgmr.msra.gmra.mxu1 %vm159_vm1, %v482_v26  ;;  %793 = vmatpush.msrb.mxu0 %v773_v7  ;;  %v856_v43 = vadd.f32 %v855_v41, %v854_v40  ;;  %v567_v62 = vand.u32 2147483647, %v452_v35  ;;  %vm563_vm10 = vweird.f32 %v452_v35  ;;  %vm549_vm13 = vweird.f32 %v1007_v47 }
 0x2b4   :  { %v531_v56 = vmul.f32 %v1005_v29, %v530_v37  ;;  %v545_v63 = vsub.f32 1.0, %v544_v59  ;;  %v570_v3 = vor.u32 1.1754944e-38, %v569_v53  ;;  %vm550_vm15 = vmor %vm548_vm14, %vm549_vm13 }
 0x2b5   :  { %v858_v50 = vadd.f32 %v857_v45, %v856_v43  ;;  %vm568_vm12 = vcmp.eq.f32.partialorder %v567_v62, 8.507059e+37  ;;  %v814_v43 = vld [vmem:[#allocation8 + $0x8] sm:$0xff] }
 0x2b6   :  { %v532_v44 = vadd.f32 %v1005_v29, %v531_v56  ;;  %v546_v6 = vmul.f32 %v1007_v47, %v545_v63  ;;  %v816_v56 = vld [vmem:[#allocation8 + $0x18] sm:$0xff] }
 0x2b7   :  { %v747_v49 = vpop.permute.xlu0 %746  ;;  %v873_v57 = vmul.f32 %v1381_v46, %v858_v50 }
 0x2b8   :  { %v1009_v51 = vpop.eup %1008  ;;  %v536_v52 = vsel %vm535_vm7, %v1005_v29, %v532_v44  ;;  %v547_v9 = vadd.f32 %v1007_v47, %v546_v6  ;;  %v813_v44 = vld [vmem:[#allocation8] sm:$0xff]  ;;  %vm690_vm7 = vcmask 130048  }
 0x2b9   :  { %v541_v54 = vsel %vm538_vm8, %v540_v48, %v536_v52  ;;  %v559_v55 = vmul.f32 %v1009_v51, %v452_v35  ;;  %875 = vst.msk [vmem:[#allocation11] sm:$0xff] %vm159_vm1, %v873_v57  ;;  %vm564_vm9 = vweird.f32 %v1009_v51  ;;  %vm692_vm8 = vcmask 195584  }
 0x2ba   :  { %v542_v58 = vmul.f32 %v1318_v20, %v541_v54  ;;  %vm565_vm11 = vmor %vm563_vm10, %vm564_vm9  ;;  %v551_v2 = vsel %vm550_vm15, %v1007_v47, %v547_v9 }
 0x2bb   :  { %v560_v60 = vsub.f32 1.0, %v559_v55 }
 0x2bc   :  { %941 = vmatmul.msk.f32.vlgmr.msrb.gmra.mxu2 %vm159_vm1, %v542_v58  ;;  %v860_v30 = vsel %vm159_vm1, %v542_v58, 0.0 }
 0x2bd   :  { %v561_v61 = vmul.f32 %v1009_v51, %v560_v60  ;;  %v977_v60 = vld [vmem:[%s1435_s5] ss:$0 sm:$0xff] }
 0x2bf   :  { %v562_v0 = vadd.f32 %v1009_v51, %v561_v61  ;;  %v695_v1 = vpop.permute.xlu0 %694 }
 0x2c0   :  { %715 = vmatpush.msrb.mxu1 %v695_v1 }
 0x2c1   :  { %v566_v20 = vsel %vm565_vm11, %v1009_v51, %v562_v0 }
 0x2c2   :  { %v571_v5 = vsel %vm568_vm12, %v570_v3, %v566_v20  ;;  %839 = vmatpush.msra.mxu1 %v816_v56 }
 0x2c3   :  { %v572_v8 = vmul.f32 %v1328_v27, %v571_v5  ;;  %v556_v27 = vsel %vm553_vm2, %v555_v4, %v551_v2 }
 0x2c4   :  { %v557_v13 = vmul.f32 %v1322_v24, %v556_v27  ;;  %840 = vmatpush.msra.mxu1 %v815_v42 }
 0x2c5   :  { %943 = vmatmul.msk.f32.vlgmr.msrb.gmra.mxu0 %vm159_vm1, %v572_v8  ;;  %v864_v36 = vsel %vm159_vm1, %v572_v8, 0.0 }
 0x2c6   :  { %v862_v34 = vsel %vm159_vm1, %v557_v13, 0.0  ;;  %841 = vmatpush.msra.mxu1 %v814_v43 }
 0x2c8   :  { %842 = vmatpush.msra.mxu1 %v813_v44 }
 0x2c9   :  { %v652_v12 = vpop.permute.xlu1 %651 }
 0x2ca   :  { %672 = vmatpush.msrb.mxu3 %v652_v12 }
 0x2cb   :  { %939 = vmatmul.msk.f32.vlgmr.msrb.gmra.mxu3 %vm159_vm1, %v1371_v21 }
 0x2cc   :  { %767 = vmatpush.msra.mxu3 %v747_v49 }
 0x2d3   :  { %942 = vmatmul.msk.f32.vlgmr.msra.gmra.mxu3 %vm159_vm1, %v557_v13 }
 0x2f4   :  { %v443_v15 = vpop.xlane.xlu1 %442 }
 0x2f5   :  { %1010 = vrcp.f32 %v443_v15  ;;  %v524_v19 = vand.u32 2147483648, %v443_v15  ;;  %v522_v23 = vand.u32 2147483647, %v443_v15  ;;  %vm518_vm4 = vweird.f32 %v443_v15 }
 0x2f7   :  { %v525_v26 = vor.u32 1.1754944e-38, %v524_v19  ;;  %vm523_vm6 = vcmp.eq.f32.partialorder %v522_v23, 8.507059e+37 }
 0x2fb   :  { %v1011_v16 = vpop.eup %1010 }
 0x2fc   :  { %v514_v17 = vmul.f32 %v1011_v16, %v443_v15  ;;  %vm519_vm3 = vweird.f32 %v1011_v16 }
 0x2fd   :  { %vm520_vm5 = vmor %vm518_vm4, %vm519_vm3 }
 0x2fe   :  { %v515_v14 = vsub.f32 1.0, %v514_v17 }
 0x300   :  { %v516_v22 = vmul.f32 %v1011_v16, %v515_v14 }
 0x302   :  { %v517_v25 = vadd.f32 %v1011_v16, %v516_v22 }
 0x304   :  { %v521_v28 = vsel %vm520_vm5, %v1011_v16, %v517_v25 }
 0x305   :  { %v526_v29 = vsel %vm523_vm6, %v525_v26, %v521_v28 }
 0x306   :  { %v527_v24 = vmul.f32 %v1339_v32, %v526_v29 }
 0x308   :  { %v859_v31 = vsel %vm159_vm1, %v527_v24, 0.0  ;;  %940 = vmatmul.msk.f32.vlgmr.msrb.gmra.mxu1 %vm159_vm1, %v527_v24 }
 0x309   :  { %v861_v33 = vadd.f32 %v860_v30, %v859_v31 }
 0x30b   :  { %v863_v35 = vadd.f32 %v862_v34, %v861_v33 }
 0x30d   :  { %v865_v21 = vadd.f32 %v864_v36, %v863_v35 }
 0x30f   :  { %v874_v18 = vmul.f32 %v1381_v46, %v865_v21 }
 0x311   :  { %876 = vst.msk [vmem:[#allocation11 + $0x8] sm:$0xff] %vm159_vm1, %v874_v18 }
 0x32a   :  { %v596_v38 = vpop.f32.mrf.mxu3 }
 0x32b   :  { %v648_v37 = vpop.f32.mrf.mxu2 }
 0x32c   :  { %682 = vrot.lane.b32.xlu0 %v648_v37, %s1167_s9 }
 0x330   :  { %v622_v32 = vpop.f32.mrf.mxu1 }
 0x331   :  { %678 = vrot.lane.b32.xlu2 %v622_v32, %s1171_s1 }
 0x33f   :  { %v743_v7 = vpop.f32.mrf.mxu2 }
 0x340   :  { %799 = vrot.lane.b32.xlu0 %v743_v7, %s1171_s1 }
 0x342   :  { %v795_v39 = vpop.f32.mrf.mxu0 }
 0x348   :  { %807 = vrot.lane.b32.xlu0 %v795_v39, %s1186_s11 }
 0x34e   :  { %v674_v40 = vpop.f32.mrf.mxu3 }
 0x34f   :  { %686 = vrot.lane.b32.xlu2 %v674_v40, %s1186_s11 }
 0x356   :  { %v769_v41 = vpop.f32.mrf.mxu3 }
 0x357   :  { %803 = vrot.lane.b32.xlu2 %v769_v41, %s1167_s9  ;;  %s1187_s9 = smov [#allocation11]  }
 0x358   :  { %s894_s12 = sshll.u32 %s1187_s9, 4  ;;  %s895_s12 = int_to_ptr.vmem [resolvable:$true] %s894_s12 }
 0x359   :  { %902 = dma.vmem_to_hbm [thread:$0]  %s895_s12, 256, %s897_s16, [#allocation12], %s1170_s13, %s1170_s13, %s1171_s1  }
 0x385   :  { %v717_v52 = vpop.f32.mrf.mxu1 }
 0x38b   :  { %v679_v45 = vpop.permute.xlu2 %678 }
 0x38c   :  { %v689_v47 = vsel %vm159_vm1, %v596_v38, %v679_v45 }
 0x39e   :  { %v683_v46 = vpop.permute.xlu0 %682 }
 0x39f   :  { %v691_v48 = vsel %vm690_vm7, %v689_v47, %v683_v46 }
 0x3a9   :  { %v687_v49 = vpop.permute.xlu2 %686 }
 0x3aa   :  { %v693_v50 = vsel %vm692_vm8, %v691_v48, %v687_v49 }
 0x3ab   :  { %944 = vmatmul.msk.f32.vlgmr.msra.gmra.mxu1 %vm114_vm0, %v693_v50 }
 0x3b1   :  { %v804_v55 = vpop.permute.xlu2 %803 }
 0x3b2   :  { %v800_v51 = vpop.permute.xlu0 %799 }
 0x3b3   :  { %v810_v54 = vsel %vm159_vm1, %v717_v52, %v800_v51 }
 0x3b4   :  { %v811_v58 = vsel %vm690_vm7, %v810_v54, %v804_v55 }
 0x3ba   :  { %v808_v57 = vpop.permute.xlu0 %807 }
 0x3bb   :  { %v812_v59 = vsel %vm692_vm8, %v811_v58, %v808_v57 }
 0x3bc   :  { %945 = vmatmul.msk.f32.gmra.mxu1 %vm114_vm0, %v812_v59 }
 0x428   :  { %v844_v53 = vpop.f32.mrf.mxu1 }
 0x429   :  { %v845_v61 = vadd.f32 %v977_v60, %v844_v53 }
 0x42b   :  { %850 = vst.msk [vmem:[#allocation10] sm:$0xff] %vm114_vm0, %v845_v61 }
 0x439   :  { %v847_v62 = vpop.f32.mrf.mxu1 }
 0x43a   :  { %v848_v63 = vadd.f32 %v977_v60, %v847_v62 }
 0x43c   :  { %851 = vst.msk [vmem:[#allocation10 + $0x8] sm:$0xff] %vm114_vm0, %v848_v63 }
 0x43d   :  { %889 = dma.vmem_to_hbm [thread:$0]  %s882_s19, 256, %s884_s7, [#allocation4], %s1170_s13, %s1170_s13, %s1171_s1  }
 0x43e   :  { %1162 = dma.done.wait [#allocation4], 256  }
 0x43f   :  { %1163 = vsyncadd [#allocation4], 4294967040 }
 0x440   :  { %1164 = dma.done.wait [#allocation12], 256  }
 0x441   :  { %1165 = vsyncadd [#allocation12], 4294967040 }
 0x442   :  { %911 = vsyncpa [#allocation3], 1 }
 0x443   :  { %912 = vsyncpa [#allocation6], 1 }
 0x444   :  { %913 = vsyncpa [#allocation9], 1 }
 0x445   :  { %914 = vsyncpa [#allocation4], 1 }
 0x446   :  { %915 = vsyncpa [#allocation12], 1 }

</bundles_post_ra>
